<compile_context>
chip_gen: v6e
topology: v6e:2x2x1
jax: 0.10.0
libtpu: 0.0.40
codegen_flags: <defaults>
</compile_context>

<pallas_src>
import math
from typing import NamedTuple

import jax
import jax.numpy as jnp
from jax.experimental import pallas as pl
from jax.experimental.pallas import tpu as pltpu

_INV_SQRT2 = 1.0 / math.sqrt(2.0)


def _gelu_exact(x):
    # Exact (erf-based) GELU, matching torch.nn.GELU() default.
    return 0.5 * x * (1.0 + jax.lax.erf(x * _INV_SQRT2))


def _round_up(x, m):
    return ((x + m - 1) // m) * m


def _vmem_capacity_bytes():
    # Physical VMEM per core: 128 MiB on v5e/v6e, 64 MiB on v7x.
    try:
        return int(pltpu.get_tpu_info().vmem_capacity_bytes)
    except Exception:
        return 64 * 1024 * 1024  # conservative (safe on every generation)


def _vmem_tile_bytes(tm, tf, dm_pad, isx, isw, with_acc):
    x_buf = 2 * tm * dm_pad * isx            # double-buffered x tile
    w_buf = 2 * (3 * dm_pad * tf) * isw      # double-buffered [W1|Wv] (2*tf) + W2 (tf)
    o_buf = 2 * tm * dm_pad * isx            # double-buffered output tile
    acc = (tm * dm_pad * 4) if with_acc else 0
    tmp = 3 * tm * tf * 4                    # f32 hv (2*tf) + gated (tf) temporaries
    return x_buf + w_buf + o_buf + acc + tmp


class GegluParams(NamedTuple):
    w1v: jax.Array   # (dm_pad, (dff_pad // tf) * 2 * tf): per-tile [W1_k | Wv_k]
    w2: jax.Array    # (dff_pad, dm_pad)
    d_model: int
    d_ff: int
    dm_pad: int
    dff_pad: int
    tf: int


def prepare_geglu_weights(w1, wv, w2, *, tf=512):
    """Pad + pack the GEGLU weights once (hoisted out of the per-call path).

    w1, wv: (d_model, d_ff); w2: (d_ff, d_model)  (torch weights transposed).
    """
    d_model, d_ff = w1.shape
    assert wv.shape == (d_model, d_ff) and w2.shape == (d_ff, d_model)
    isw = jnp.dtype(w1.dtype).itemsize

    # 256-alignment for the 256-wide MXU on v6e/v7x; 128 for tiny dims.
    dm_align = 256 if d_model > 128 else 128
    dm_pad = _round_up(d_model, dm_align)
    dff_min = _round_up(d_ff, 128)
    tf_align = 256 if dff_min >= 256 else 128
    tf = _round_up(max(min(tf, dff_min), tf_align), tf_align)

    # Keep the double-buffered streamed-weight working set within about half
    # of the per-generation VMEM budget (rest goes to the row tile).
    w_budget = int(0.85 * _vmem_capacity_bytes()) // 2
    while tf > tf_align and 2 * (3 * dm_pad * tf) * isw > w_budget:
        tf = max(tf_align, _round_up(tf // 2, tf_align))

    dff_pad = _round_up(d_ff, tf)
    nk = dff_pad // tf

    if (d_model, d_ff) != (dm_pad, dff_pad):
        w1 = jnp.pad(w1, ((0, dm_pad - d_model), (0, dff_pad - d_ff)))
        wv = jnp.pad(wv, ((0, dm_pad - d_model), (0, dff_pad - d_ff)))
        w2 = jnp.pad(w2, ((0, dff_pad - d_ff), (0, dm_pad - d_model)))

    # Interleave per d_ff tile so block k == [W1[:, k*tf:(k+1)*tf] | Wv[:, ...]]
    # -> one weight DMA stream + one long MXU push sequence per grid step.
    w1v = jnp.concatenate(
        [w1.reshape(dm_pad, nk, tf), wv.reshape(dm_pad, nk, tf)], axis=-1
    ).reshape(dm_pad, nk * 2 * tf)

    return GegluParams(w1v, w2, d_model, d_ff, dm_pad, dff_pad, tf)


def _geglu_kernel_single(x_ref, w1v_ref, w2_ref, o_ref):
    """grid = (row tiles,). Whole d_ff in one step; weights stay resident
    across row tiles (constant block index -> Pallas skips the re-fetch)."""
    tf = w2_ref.shape[0]
    x = x_ref[...]                                   # native dtype into the MXU
    hv = jnp.dot(x, w1v_ref[...], preferred_element_type=jnp.float32)
    gated = _gelu_exact(hv[:, :tf]) * hv[:, tf:]     # f32 elementwise math
    o_ref[...] = jnp.dot(
        gated.astype(w2_ref.dtype), w2_ref[...], preferred_element_type=jnp.float32
    ).astype(o_ref.dtype)


def _geglu_kernel_reduce(x_ref, w1v_ref, w2_ref, o_ref, acc_ref):
    """grid = (row tiles, d_ff tiles); d_ff is the last, 'arbitrary' axis."""
    k = pl.program_id(1)
    tf = w2_ref.shape[0]

    x = x_ref[...]
    hv = jnp.dot(x, w1v_ref[...], preferred_element_type=jnp.float32)
    gated = _gelu_exact(hv[:, :tf]) * hv[:, tf:]
    partial = jnp.dot(
        gated.astype(w2_ref.dtype), w2_ref[...], preferred_element_type=jnp.float32
    )

    @pl.when(k == 0)
    def _():
        acc_ref[...] = partial          # assign (no zero-init + RMW on step 0)

    @pl.when(k > 0)
    def _():
        acc_ref[...] += partial

    @pl.when(k == pl.num_programs(1) - 1)
    def _():
        o_ref[...] = acc_ref[...].astype(o_ref.dtype)


def geglu_forward(x, w1=None, wv=None, w2=None, *, params=None, tm=512, tf=512):
    """GEGLU forward: (GELU(x @ W1) * (x @ Wv)) @ W2, all linears bias-free.

    Pass either raw (w1, wv, w2) or a pre-built `params` from
    prepare_geglu_weights (preferred: hoists padding/packing off the hot path).
    tm: row-tile target (multiple of 8). Dropout is identity at inference.
    """
    # TODO(synk): training-mode dropout not implemented (inference identity).
    if params is None:
        params = prepare_geglu_weights(w1, wv, w2, tf=tf)

    orig_shape = x.shape
    d_model = orig_shape[-1]
    assert d_model == params.d_model
    dm_pad, dff_pad, tf = params.dm_pad, params.dff_pad, params.tf
    nk = dff_pad // tf

    x2d = x.reshape(-1, d_model)
    n = x2d.shape[0]
    isx = jnp.dtype(x.dtype).itemsize
    isw = jnp.dtype(params.w1v.dtype).itemsize

    vmem_cap = _vmem_capacity_bytes()
    budget = int(0.85 * vmem_cap)

    # --- row tile -----------------------------------------------------------
    tm = _round_up(min(tm, _round_up(n, 8)), 8)
    # When weights are fully resident (nk == 1) splitting rows adds no weight
    # traffic: guarantee >= 2 row tiles so the 'parallel' axis can shard
    # across both TensorCores on v7x.
    if nk == 1 and n > 8:
        while tm > 8 and _round_up(n, tm) // tm < 2:
            tm = _round_up(tm // 2, 8)
    # Shrink tm until the working set fits the per-generation VMEM budget.
    while tm > 8 and _vmem_tile_bytes(tm, tf, dm_pad, isx, isw, nk > 1) > budget:
        tm = max(8, _round_up(tm // 2, 8))

    n_pad = _round_up(n, tm)
    if (n, d_model) == (n_pad, dm_pad):
        x_p = x2d
    else:
        x_p = jnp.pad(x2d, ((0, n_pad - n), (0, dm_pad - d_model)))

    row_tiles = n_pad // tm
    tile_bytes = _vmem_tile_bytes(tm, tf, dm_pad, isx, isw, nk > 1)
    vmem_limit = min(int(0.9 * vmem_cap), max(tile_bytes + (4 << 20), 32 << 20))

    weight_reads = row_tiles if nk > 1 else 1      # resident weights read once
    cost = pl.CostEstimate(
        flops=6 * n_pad * dm_pad * dff_pad,
        transcendentals=n_pad * dff_pad,
        bytes_accessed=2 * n_pad * dm_pad * isx
        + weight_reads * 3 * dm_pad * dff_pad * isw,
    )

    if nk == 1:
        grid_spec = pltpu.PrefetchScalarGridSpec(
            num_scalar_prefetch=0,
            grid=(row_tiles,),
            in_specs=[
                pl.BlockSpec((tm, dm_pad), lambda i: (i, 0)),        # x row tile
                pl.BlockSpec((dm_pad, 2 * tf), lambda i: (0, 0)),    # [W1|Wv] resident
                pl.BlockSpec((tf, dm_pad), lambda i: (0, 0)),        # W2 resident
            ],
            out_specs=pl.BlockSpec((tm, dm_pad), lambda i: (i, 0)),
        )
        kernel = _geglu_kernel_single
        dim_sem = ("parallel",)
    else:
        grid_spec = pltpu.PrefetchScalarGridSpec(
            num_scalar_prefetch=0,
            grid=(row_tiles, nk),
            in_specs=[
                pl.BlockSpec((tm, dm_pad), lambda i, k: (i, 0)),      # x row tile
                pl.BlockSpec((dm_pad, 2 * tf), lambda i, k: (0, k)),  # [W1|Wv] d_ff tile
                pl.BlockSpec((tf, dm_pad), lambda i, k: (k, 0)),      # W2 d_ff tile
            ],
            out_specs=pl.BlockSpec((tm, dm_pad), lambda i, k: (i, 0)),
            scratch_shapes=[pltpu.VMEM((tm, dm_pad), jnp.float32)],
        )
        kernel = _geglu_kernel_reduce
        dim_sem = ("parallel", "arbitrary")

    out = pl.pallas_call(
        kernel,
        out_shape=jax.ShapeDtypeStruct((n_pad, dm_pad), x.dtype),
        grid_spec=grid_spec,
        compiler_params=pltpu.CompilerParams(
            dimension_semantics=dim_sem,
            vmem_limit_bytes=vmem_limit,
        ),
        cost_estimate=cost,
    )(x_p, params.w1v, params.w2)

    out = out[:n, :d_model]
    return out.reshape(orig_shape)


if __name__ == "__main__":
    key = jax.random.PRNGKey(0)

    def make_weights(k, d_model, d_ff, dtype=jnp.float32):
        k1, kv, k2 = jax.random.split(k, 3)
        b1 = 1.0 / math.sqrt(d_model)
        b2 = 1.0 / math.sqrt(d_ff)
        # Stored as (in, out) == transpose of torch's (out, in); no biases.
        w1 = jax.random.uniform(k1, (d_model, d_ff), dtype, -b1, b1)
        wv = jax.random.uniform(kv, (d_model, d_ff), dtype, -b1, b1)
        w2 = jax.random.uniform(k2, (d_ff, d_model), dtype, -b2, b2)
        return w1, wv, w2

    def reference(x, w1, wv, w2):
        return (jax.nn.gelu(x @ w1, approximate=False) * (x @ wv)) @ w2

    # --- check 1: small module-consistent shapes; resident-weight path ------
    batch, seq, d_model, d_ff = 2, 8, 32, 64
    key, kx, kw = jax.random.split(key, 3)
    x = jax.random.normal(kx, (batch, seq, d_model), dtype=jnp.float32)
    w1, wv, w2 = make_weights(kw, d_model, d_ff)
    params = prepare_geglu_weights(w1, wv, w2)      # hoisted weight prep
    out = jax.block_until_ready(geglu_forward(x, params=params))
    ref = reference(x, w1, wv, w2)
    assert out.shape == (batch, seq, d_model)
    assert jnp.allclose(out, ref, atol=2e-4, rtol=2e-4), "mismatch vs reference (1)"

    # --- check 2: non-128-multiple dims + multi-step d_ff reduction ---------
    d_model2, d_ff2 = 160, 384
    key, kx, kw = jax.random.split(key, 3)
    x2 = jax.random.normal(kx, (batch, seq, d_model2), dtype=jnp.float32)
    w1b, wvb, w2b = make_weights(kw, d_model2, d_ff2)
    out2 = jax.block_until_ready(geglu_forward(x2, w1b, wvb, w2b, tm=16, tf=256))
    ref2 = reference(x2, w1b, wvb, w2b)
    assert out2.shape == (batch, seq, d_model2)
    assert jnp.allclose(out2, ref2, atol=2e-4, rtol=2e-4), "mismatch vs reference (2)"

    # --- check 3: multiple row tiles x multiple reduction steps -------------
    batch3, seq3, d_model3, d_ff3 = 4, 96, 256, 1024
    key, kx, kw = jax.random.split(key, 3)
    x3 = jax.random.normal(kx, (batch3, seq3, d_model3), dtype=jnp.float32)
    w1c, wvc, w2c = make_weights(kw, d_model3, d_ff3)
    params3 = prepare_geglu_weights(w1c, wvc, w2c, tf=512)
    out3 = jax.block_until_ready(geglu_forward(x3, params=params3, tm=128))
    ref3 = reference(x3, w1c, wvc, w2c)
    assert out3.shape == (batch3, seq3, d_model3)
    assert jnp.allclose(out3, ref3, atol=2e-4, rtol=2e-4), "mismatch vs reference (3)"

    print("KERNEL_OK")
</pallas_src>

<mosaic_0001>
module attributes {stable_mosaic.version = 11 : i64} {
  func.func @_geglu_kernel_single(%arg0: i32, %arg1: memref<8x128xf32, #tpu.memory_space<vmem>>, %arg2: memref<128x256xf32, #tpu.memory_space<vmem>>, %arg3: memref<128x128xf32, #tpu.memory_space<vmem>>, %arg4: memref<8x128xf32, #tpu.memory_space<vmem>>) attributes {dimension_semantics = [#tpu.dimension_semantics<parallel>], iteration_bounds = array<i64: 2>, scalar_prefetch = 0 : i64, scratch_operands = 0 : i64, tpu.core_type = #tpu.core_type<tc>, window_params = [{transform_indices = @transform_0, window_bounds = array<i64: 8, 128>}, {pipeline_mode = #tpu.pipeline_mode<synchronous>, transform_indices = @transform_1, window_bounds = array<i64: 128, 256>}, {pipeline_mode = #tpu.pipeline_mode<synchronous>, transform_indices = @transform_2, window_bounds = array<i64: 128, 128>}, {transform_indices = @transform_3, window_bounds = array<i64: 8, 128>}]} {
    %c0 = arith.constant 0 : index
    %c0_0 = arith.constant 0 : index
    %0 = vector.load %arg1[%c0, %c0_0] : memref<8x128xf32, #tpu.memory_space<vmem>>, vector<8x128xf32>
    %c0_1 = arith.constant 0 : index
    %c0_2 = arith.constant 0 : index
    %1 = vector.load %arg2[%c0_1, %c0_2] : memref<128x256xf32, #tpu.memory_space<vmem>>, vector<128x256xf32>
    %cst = arith.constant dense<0.000000e+00> : vector<8x256xf32>
    %2 = tpu.matmul %0, %1, %cst {dimension_numbers = #tpu.dot_dimension_numbers<[1], [0], [0], [1], [0, 0, 1, 1], [], []>} : vector<8x128xf32>, vector<128x256xf32>, vector<8x256xf32> -> vector<8x256xf32>
    %3 = vector.extract_strided_slice %2 {offsets = [0, 0], sizes = [8, 128], strides = [1, 1]} : vector<8x256xf32> to vector<8x128xf32>
    %cst_3 = arith.constant 5.000000e-01 : f32
    %4 = vector.broadcast %cst_3 : f32 to vector<8x128xf32>
    %5 = arith.mulf %4, %3 : vector<8x128xf32>
    %cst_4 = arith.constant 0.707106769 : f32
    %6 = vector.broadcast %cst_4 : f32 to vector<8x128xf32>
    %7 = arith.mulf %3, %6 : vector<8x128xf32>
    %8 = math.erf %7 : vector<8x128xf32>
    %cst_5 = arith.constant 1.000000e+00 : f32
    %9 = vector.broadcast %cst_5 : f32 to vector<8x128xf32>
    %10 = arith.addf %9, %8 : vector<8x128xf32>
    %11 = arith.mulf %5, %10 : vector<8x128xf32>
    %12 = vector.extract_strided_slice %2 {offsets = [0, 128], sizes = [8, 128], strides = [1, 1]} : vector<8x256xf32> to vector<8x128xf32>
    %13 = arith.mulf %11, %12 : vector<8x128xf32>
    %c0_6 = arith.constant 0 : index
    %c0_7 = arith.constant 0 : index
    %14 = vector.load %arg3[%c0_6, %c0_7] : memref<128x128xf32, #tpu.memory_space<vmem>>, vector<128x128xf32>
    %cst_8 = arith.constant dense<0.000000e+00> : vector<8x128xf32>
    %15 = tpu.matmul %13, %14, %cst_8 {dimension_numbers = #tpu.dot_dimension_numbers<[1], [0], [0], [1], [0, 0, 1, 1], [], []>} : vector<8x128xf32>, vector<128x128xf32>, vector<8x128xf32> -> vector<8x128xf32>
    %c0_9 = arith.constant 0 : index
    %c0_10 = arith.constant 0 : index
    %16 = vector.load %arg4[%c0_9, %c0_10] : memref<8x128xf32, #tpu.memory_space<vmem>>, vector<8x128xf32>
    tpu.vector_store %arg4[%c0_9, %c0_10], %15 {strides = array<i32>} : memref<8x128xf32, #tpu.memory_space<vmem>>, vector<8x128xf32>,
    return
  }
  func.func @transform_0(%arg0: i32) -> (i32, i32) {
    %c0_i32 = arith.constant 0 : i32
    %c0_i32_0 = arith.constant 0 : i32
    return %arg0, %c0_i32 : i32, i32
  }
  func.func @transform_1(%arg0: i32) -> (i32, i32) {
    %c0_i32 = arith.constant 0 : i32
    %c0_i32_0 = arith.constant 0 : i32
    %c0_i32_1 = arith.constant 0 : i32
    return %c0_i32, %c0_i32_0 : i32, i32
  }
  func.func @transform_2(%arg0: i32) -> (i32, i32) {
    %c0_i32 = arith.constant 0 : i32
    %c0_i32_0 = arith.constant 0 : i32
    %c0_i32_1 = arith.constant 0 : i32
    return %c0_i32, %c0_i32_0 : i32, i32
  }
  func.func @transform_3(%arg0: i32) -> (i32, i32) {
    %c0_i32 = arith.constant 0 : i32
    %c0_i32_0 = arith.constant 0 : i32
    return %arg0, %c0_i32 : i32, i32
  }
}

</mosaic_0001>

<bundles_post_ra>
// kernel: tpu_custom_call.1
= control target key start
LH: loop header
LB: loop body
LE: loop exit
PB: predicated region body
PF: predicated region fallthrough
CT: control target
= control target key end

     0   :  { %8 = vsyncpa [#allocation3], 0  ;;  %s1040_s0 = inlined_call_operand.hbm [shape: f32[16,128], index: 0, kind: input, shape index: {}]   ;;  %s1041_s1 = inlined_call_operand.hbm [shape: f32[128,256], index: 1, kind: input, shape index: {}]   ;;  %s1042_s2 = inlined_call_operand.hbm [shape: f32[128,128], index: 2, kind: input, shape index: {}]   ;;  %s1043_s3 = inlined_call_operand.hbm [shape: f32[16,128], index: 3, kind: output, shape index: {}]  }
   0x1   :  { %10 = vsyncpa [#allocation3 + $0x1], 0 }
   0x2   :  { %11 = vsyncpa [#allocation6], 0 }
   0x3   :  { %12 = vsyncpa [#allocation4], 0 }
   0x4   :  { %14 = vsyncpa [#allocation4 + $0x1], 0  ;;  %s838_s12 = smov 0   ;;  %s840_s13 = smov 0  }
   0x5   :  { %s842_s14 = smov 0   ;;  %s844_s15 = smov 0  }
   0x6 LB: > { %s859_s16 = sadd.s32 4294967295, %s806_s15   ;;  %s515_s17 = sadd.s32 4294967294, %s806_s15   ;;  %s806_s15 = sphi %s844_s15, %s1065_s15   ;;  %s802_s14 = sphi %s842_s14, %s1064_s14   ;;  %s798_s13 = sphi %s840_s13, %s1063_s13   ;;  %s794_s12 = sphi %s838_s12, %s1062_s12  }
   0x7   : > { %p40_p0 = scmp.ne.s32.totalorder %s798_s13, %s794_s12  ;;  %p1044_p1 = scmp.eq.s32.totalorder %s859_s16, 0 }
   0x8   : > { %p112_p3 = scmp.eq.s32.totalorder %s515_s17, 1  ;;  %p516_p5 = scmp.ge.s32.totalorder %s806_s15, 1 }
   0x9   : > { %p868_p4 = por %p1044_p1, %p40_p0  ;;  %p119_p7 = scmp.lt.s32.totalorder %s806_s15, 3 }
   0xa   : > { %p873_p6 = por %p112_p3, %p40_p0  ;;  %s808_s21 = smov [#allocation5]  }
   0xb   : > { %s1048_s18 = scalar_select %p868_p4, 1, 0 }
   0xc   : > { %s1049_s19 = scalar_select %p873_p6, 1, 0 }
   0xd   : > { %p878_p8 = pnand %p516_p5, %p119_p7  ;;  %s131_s22 = sshll.u32 %s808_s21, 4  ;;  %s132_s22 = int_to_ptr.vmem [resolvable:$true] %s131_s22 }
   0xe   : > { %s809_s24 = smov [#allocation7]   ;;  %s669_s26 = scalar_lea.vmem %s132_s22, 4096 }
   0xf   : > { %s1050_s20 = scalar_select %p878_p8, 1, 0 }
  0x10   : > { %p595_p9 = pneg %p878_p8  ;;  %s144_s25 = sshll.u32 %s809_s24, 4  ;;  %s145_s25 = int_to_ptr.vmem [resolvable:$true] %s144_s25 }
  0x11   : > { %p670_p13 = scmp.ne.s32.totalorder %s132_s22, %s669_s26  ;;  %p677_p5 = scmp.lt.s32.totalorder %s132_s22, %s132_s22 }
  0x12   : > { %p887_p11 = pnand %p595_p9, %p1044_p1  ;;  %p678_p7 = scmp.lt.s32.totalorder %s669_s26, %s669_s26 }
  0x14   : > { %p660_p12 = pneg %p887_p11  ;;  %p679_p10 = por %p678_p7, %p677_p5 }
  0x16   : > { %p672_p0 = pnand %p670_p13, %p660_p12 }
  0x18   : > { %p673_p3 = pneg %p672_p0 }
  0x1a   : > { %p680_p9 = pnand %p679_p10, %p673_p3 }
  0x1c   : > { %683 = shalt.err (!%p680_p9)
}
  0x1d   : > { %s810_s27 = smov 256   ;;  %s811_s28 = smov 16  }
  0x1e   : > { %598 = dma.hbm_to_vmem [thread:$0]  (!%p887_p11), %s1041_s1, 4096, %s132_s22, [#allocation6], %s810_s27, %s810_s27, %s811_s28  }
  0x1f   : > { %s695_s4 = scalar_lea.vmem %s145_s25, 2048  ;;  %p703_p2 = scmp.lt.s32.totalorder %s145_s25, %s145_s25 }
  0x20   : > { %p696_p1 = scmp.ne.s32.totalorder %s145_s25, %s695_s4  ;;  %p704_p6 = scmp.lt.s32.totalorder %s695_s4, %s695_s4 }
  0x22   : > { %p698_p13 = pnand %p696_p1, %p660_p12  ;;  %p705_p5 = por %p704_p6, %p703_p2 }
  0x24   : > { %p699_p0 = pneg %p698_p13 }
  0x26   : > { %p706_p10 = pnand %p705_p5, %p699_p0 }
  0x28   : > { %709 = shalt.err (!%p706_p10)
}
  0x29   : > { %s812_s5 = smov 128   ;;  %s813_s6 = smov 8  }
  0x2a   : > { %601 = dma.hbm_to_vmem [thread:$0]  (!%p887_p11), %s1042_s2, 2048, %s145_s25, [#allocation6], %s812_s5, %s812_s5, %s813_s6  }
  0x2b   : > { %s910_s9 = sadd.s32 1, %s806_s15   ;;  %s27_s11 = sadd.s32 1, %s802_s14 }
  0x2c   : > { %s24_s10 = ssub.s32 %s806_s15, %s910_s9  ;;  %p34_p2 = scmp.ne.s32.totalorder %s802_s14, %s798_s13 }
  0x2d   : > { %p25_p1 = scmp.eq.s32.totalorder %s24_s10, 0  ;;  %p35_p6 = scmp.eq.s32.totalorder %s806_s15, 0 }
  0x2e   : > { %p1052_p3 = scmp.eq.s32.totalorder %s859_s16, 1  ;;  %p612_p9 = scmp.lt.s32.totalorder %s806_s15, 2 }
  0x2f   : > { %s919_s17 = scalar_select %p25_p1, %s802_s14, %s27_s11  }
  0x30   : > { %p36_p12 = por %p35_p6, %p34_p2  ;;  %p923_p7 = por %p1052_p3, %p34_p2 }
  0x31   : > { %s158_s22 = sand.u32 1, %s802_s14   ;;  %s521_s24 = sshll.u32 %s806_s15, 7 }
  0x32   : > { %s1053_s21 = scalar_select %p923_p7, 1, 0 }
  0x33   : > { %s520_s23 = sshll.u32 %s158_s22, 3  ;;  %s933_s27 = scalar_lea.hbm %s1040_s0, %s521_s24 }
  0x34   : > { %s162_s28 = scalar_lea.vmem [#allocation2], %s520_s23  ;;  %p935_p11 = pnand %p612_p9, %p36_p12 }
  0x35   : > { %s169_s29 = sshll.u32 %s162_s28, 4  ;;  %s159_s4 = scalar_lea.sflag [#allocation3], %s158_s22  ;;  %s170_s29 = int_to_ptr.vmem [resolvable:$true] %s169_s29 }
  0x36   : > { %s710_s5 = scalar_lea.hbm %s933_s27, 128  ;;  %p712_p0 = pneg %p935_p11 }
  0x37   : > { %p711_p13 = scmp.ne.s32.totalorder %s933_s27, %s710_s5  ;;  %s715_s8 = scalar_lea.hbm %s1040_s0, 256 }
  0x38   : > { %p716_p1 = scmp.lt.s32.totalorder %s933_s27, %s1040_s0  ;;  %p717_p2 = scmp.lt.s32.totalorder %s715_s8, %s710_s5 }
  0x39   : > { %p713_p5 = pnand %p712_p0, %p711_p13 }
  0x3a   : > { %p718_p6 = por %p717_p2, %p716_p1 }
  0x3b   : > { %p714_p10 = pneg %p713_p5 }
  0x3d   : > { %p719_p12 = pnand %p718_p6, %p714_p10 }
  0x3f   : > { %722 = shalt.err (!%p719_p12)
}
  0x40   : > { %s723_s23 = scalar_lea.vmem %s170_s29, 128  ;;  %s814_s22 = smov [#allocation2]  }
  0x41   : > { %p724_p3 = scmp.ne.s32.totalorder %s170_s29, %s723_s23  ;;  %s728_s24 = sshll.u32 %s814_s22, 4  ;;  %s729_s24 = int_to_ptr.vmem [resolvable:$false] %s728_s24 }
  0x42   : > { %s730_s25 = scalar_lea.vmem %s729_s24, 256  ;;  %p731_p13 = scmp.lt.s32.totalorder %s170_s29, %s729_s24 }
  0x43   : > { %p726_p9 = pnand %p724_p3, %p712_p0  ;;  %p732_p5 = scmp.lt.s32.totalorder %s730_s25, %s723_s23 }
  0x45   : > { %p727_p7 = pneg %p726_p9  ;;  %p733_p4 = por %p732_p5, %p731_p13 }
  0x47   : > { %p734_p8 = pnand %p733_p4, %p727_p7 }
  0x49   : > { %737 = shalt.err (!%p734_p8)
}
  0x4a   : > { %605 = dma.hbm_to_vmem [thread:$0]  (!%p935_p11), %s933_s27, 128, %s170_s29, %s159_s4  }
  0x4b   : > { %p1055_p10 = scmp.ne.s32.totalorder %s1050_s20, 0 }
  0x4c   : > { %s956_s26 = sand.u32 (!%p1055_p10), 1, %s798_s13   ;;  %p1056_p4 = scmp.ne.s32.totalorder (!%p1055_p10), %s1048_s18, 0 }
  0x4d   : > { %178 = sbr.rel (%p1055_p10) target bundleno = 542 (0x21e), region = 32  ;;  %s523_s28 = sshll.u32 (!%p1055_p10), %s956_s26, 3 }
  0x4e   : > { %s181_s5 = scalar_lea.sflag (!%p1055_p10), [#allocation3], %s956_s26  ;;  %s962_s6 = scalar_lea.vmem (!%p1055_p10), [#allocation2], %s523_s28 }
  0x52   : > { %781 = dma.done.wait (%p1056_p4), %s181_s5, 128  }
  0x53   : > { %783 = vsyncadd (%p1056_p4), %s181_s5, 4294967168  ;;  %p1057_p8 = scmp.eq.s32.totalorder %s859_s16, 0 }
  0x55   : > { %785 = dma.done.wait (%p1057_p8), [#allocation6], 6144   ;;  %p1058_p7 = pmov %p1057_p8 }
  0x56   : > { %v815_v0 = vmov 0.0   ;;  %v247_v1 = vld [vmem:[#allocation5 + $0xf8] sm:$0xff]  ;;  %v246_v2 = vld [vmem:[#allocation5 + $0xf0] sm:$0xff]  ;;  %v245_v3 = vld [vmem:[#allocation5 + $0xe8] sm:$0xff]  ;;  %vm816_vm0 = vmmov 0   ;;  %s214_s18 = scalar_lea.vmem [#allocation8], %s523_s28 }
  0x57   : > { %787 = vsyncadd (%p1058_p7), [#allocation6], 4294961152  ;;  %312 = vmatprep.mubr.f32.mxu0 %v815_v0  ;;  %548 = vmatprep.subr.mxu1 %v815_v0  ;;  %v244_v4 = vld [vmem:[#allocation5 + $0xe0] sm:$0xff]  ;;  %v243_v5 = vld [vmem:[#allocation5 + $0xd8] sm:$0xff]  ;;  %s426_s20 = sshll.u32 %s214_s18, 4  ;;  %s528_s27 = sshll.u32 %s859_s16, 7  ;;  %s994_s20 = int_to_ptr.vmem [resolvable:$true] %s426_s20 }
  0x58   : > { %248 = vmatprep.subr.mxu0 %v247_v1  ;;  %v242_v6 = vld [vmem:[#allocation5 + $0xd0] sm:$0xff]  ;;  %v241_v7 = vld [vmem:[#allocation5 + $0xc8] sm:$0xff]  ;;  %v240_v8 = vld [vmem:[#allocation5 + $0xc0] sm:$0xff]  ;;  %580 = vmatprep.mubr.msk.f32.mxu1 %vm816_vm0, %v815_v0  ;;  %s999_s4 = scalar_lea.hbm %s1043_s3, %s528_s27  ;;  %s413_s7 = scalar_lea.sflag [#allocation4], %s956_s26 }
  0x59   : > { %249 = vmatpush1.msra.mxu0 %v246_v2  ;;  %v239_v9 = vld [vmem:[#allocation5 + $0xb8] sm:$0xff]  ;;  %v238_v10 = vld [vmem:[#allocation5 + $0xb0] sm:$0xff]  ;;  %v237_v11 = vld [vmem:[#allocation5 + $0xa8] sm:$0xff]  ;;  %s738_s8 = scalar_lea.vmem %s994_s20, 128  ;;  %p1059_p0 = scmp.ne.s32.totalorder %s1053_s21, 0 }
  0x5a   : > { %250 = vmatprep.subr.mxu0 %v245_v3  ;;  %v236_v12 = vld [vmem:[#allocation5 + $0xa0] sm:$0xff]  ;;  %v235_v13 = vld [vmem:[#allocation5 + $0x98] sm:$0xff]  ;;  %v234_v14 = vld [vmem:[#allocation5 + $0x90] sm:$0xff]  ;;  %p739_p11 = scmp.ne.s32.totalorder %s994_s20, %s738_s8  ;;  %s817_s16 = smov [#allocation8]  }
  0x5b   : > { %251 = vmatpush1.msra.mxu0 %v244_v4  ;;  %v340_v15 = vld [vmem:[#allocation7 + $0x78] sm:$0xff]  ;;  %v339_v16 = vld [vmem:[#allocation7 + $0x70] sm:$0xff]  ;;  %v233_v17 = vld [vmem:[#allocation5 + $0x88] sm:$0xff]  ;;  %s742_s10 = sshll.u32 %s817_s16, 4  ;;  %s743_s10 = int_to_ptr.vmem [resolvable:$false] %s742_s10 }
  0x5c   : > { %252 = vmatprep.subr.mxu0 %v243_v5  ;;  %549 = vmatpush3.msra.mxu1 %v340_v15  ;;  %v232_v18 = vld [vmem:[#allocation5 + $0x80] sm:$0xff]  ;;  %v338_v19 = vld [vmem:[#allocation7 + $0x68] sm:$0xff]  ;;  %v231_v20 = vld [vmem:[#allocation5 + $0x78] sm:$0xff]  ;;  %p740_p1 = pnand %p739_p11, %p1059_p0  ;;  %s744_s11 = scalar_lea.vmem %s743_s10, 256 }
  0x5d   : > { %253 = vmatpush1.msra.mxu0 %v242_v6  ;;  %550 = vmatprep.subr.mxu1 %v815_v0  ;;  %v230_v21 = vld [vmem:[#allocation5 + $0x70] sm:$0xff]  ;;  %v337_v22 = vld [vmem:[#allocation7 + $0x60] sm:$0xff]  ;;  %v229_v23 = vld [vmem:[#allocation5 + $0x68] sm:$0xff]  ;;  %p745_p6 = scmp.lt.s32.totalorder %s994_s20, %s743_s10  ;;  %p746_p12 = scmp.lt.s32.totalorder %s744_s11, %s738_s8 }
  0x5e   : > { %254 = vmatprep.subr.mxu0 %v241_v7  ;;  %551 = vmatpush3.msra.mxu1 %v339_v16  ;;  %v228_v24 = vld [vmem:[#allocation5 + $0x60] sm:$0xff]  ;;  %v227_v25 = vld [vmem:[#allocation5 + $0x58] sm:$0xff]  ;;  %v226_v26 = vld [vmem:[#allocation5 + $0x50] sm:$0xff]  ;;  %p741_p2 = pneg %p740_p1 }
  0x5f   : > { %255 = vmatpush1.msra.mxu0 %v240_v8  ;;  %552 = vmatprep.subr.mxu1 %v815_v0  ;;  %v225_v27 = vld [vmem:[#allocation5 + $0x48] sm:$0xff]  ;;  %v224_v28 = vld [vmem:[#allocation5 + $0x40] sm:$0xff]  ;;  %v223_v29 = vld [vmem:[#allocation5 + $0x38] sm:$0xff]  ;;  %p747_p3 = por %p746_p12, %p745_p6 }
  0x60   : > { %256 = vmatprep.subr.mxu0 %v239_v9  ;;  %553 = vmatpush3.msra.mxu1 %v338_v19  ;;  %v222_v30 = vld [vmem:[#allocation5 + $0x30] sm:$0xff]  ;;  %v221_v31 = vld [vmem:[#allocation5 + $0x28] sm:$0xff]  ;;  %v220_v32 = vld [vmem:[#allocation5 + $0x20] sm:$0xff] }
  0x61   : > { %257 = vmatpush1.msra.mxu0 %v238_v10  ;;  %554 = vmatprep.subr.mxu1 %v815_v0  ;;  %v219_v33 = vld [vmem:[#allocation5 + $0x18] sm:$0xff]  ;;  %v218_v34 = vld [vmem:[#allocation5 + $0x10] sm:$0xff]  ;;  %v217_v35 = vld [vmem:[#allocation5 + $0x8] sm:$0xff]  ;;  %p748_p9 = pnand %p747_p3, %p741_p2 }
  0x62   : > { %258 = vmatprep.subr.mxu0 %v237_v11  ;;  %555 = vmatpush3.msra.mxu1 %v337_v22  ;;  %v216_v36 = vld [vmem:[#allocation5] sm:$0xff]  ;;  %v215_v37 = vld [vmem:[%s962_s6] sm:$0xff]  ;;  %v334_v40 = vld [vmem:[#allocation7 + $0x48] sm:$0xff] }
  0x63   : > { %259 = vmatpush1.msra.mxu0 %v236_v12  ;;  %556 = vmatprep.subr.mxu1 %v815_v0  ;;  %v336_v38 = vld [vmem:[#allocation7 + $0x58] sm:$0xff]  ;;  %v335_v39 = vld [vmem:[#allocation7 + $0x50] sm:$0xff]  ;;  %v333_v41 = vld [vmem:[#allocation7 + $0x40] sm:$0xff] }
  0x64   : > { %260 = vmatprep.subr.mxu0 %v235_v13  ;;  %557 = vmatpush3.msra.mxu1 %v336_v38  ;;  %v332_v42 = vld [vmem:[#allocation7 + $0x38] sm:$0xff]  ;;  %v331_v43 = vld [vmem:[#allocation7 + $0x30] sm:$0xff]  ;;  %v330_v44 = vld [vmem:[#allocation7 + $0x28] sm:$0xff] }
  0x65   : > { %261 = vmatpush1.msra.mxu0 %v234_v14  ;;  %558 = vmatprep.subr.mxu1 %v815_v0  ;;  %v329_v45 = vld [vmem:[#allocation7 + $0x20] sm:$0xff]  ;;  %v328_v46 = vld [vmem:[#allocation7 + $0x18] sm:$0xff]  ;;  %v327_v47 = vld [vmem:[#allocation7 + $0x10] sm:$0xff] }
  0x66   : > { %262 = vmatprep.subr.mxu0 %v233_v17  ;;  %559 = vmatpush3.msra.mxu1 %v335_v39  ;;  %v326_v48 = vld [vmem:[#allocation7 + $0x8] sm:$0xff]  ;;  %v325_v49 = vld [vmem:[#allocation7] sm:$0xff] }
  0x67   : > { %263 = vmatpush1.msra.mxu0 %v232_v18  ;;  %560 = vmatprep.subr.mxu1 %v815_v0 }
  0x68   : > { %264 = vmatprep.subr.mxu0 %v231_v20  ;;  %561 = vmatpush3.msra.mxu1 %v334_v40 }
  0x69   : > { %265 = vmatpush1.msra.mxu0 %v230_v21  ;;  %562 = vmatprep.subr.mxu1 %v815_v0 }
  0x6a   : > { %266 = vmatprep.subr.mxu0 %v229_v23  ;;  %563 = vmatpush3.msra.mxu1 %v333_v41 }
  0x6b   : > { %267 = vmatpush1.msra.mxu0 %v228_v24  ;;  %564 = vmatprep.subr.mxu1 %v815_v0 }
  0x6c   : > { %268 = vmatprep.subr.mxu0 %v227_v25  ;;  %565 = vmatpush3.msra.mxu1 %v332_v42 }
  0x6d   : > { %269 = vmatpush1.msra.mxu0 %v226_v26  ;;  %566 = vmatprep.subr.mxu1 %v815_v0 }
  0x6e   : > { %270 = vmatprep.subr.mxu0 %v225_v27  ;;  %567 = vmatpush3.msra.mxu1 %v331_v43 }
  0x6f   : > { %271 = vmatpush1.msra.mxu0 %v224_v28  ;;  %568 = vmatprep.subr.mxu1 %v815_v0 }
  0x70   : > { %272 = vmatprep.subr.mxu0 %v223_v29  ;;  %569 = vmatpush3.msra.mxu1 %v330_v44 }
  0x71   : > { %273 = vmatpush1.msra.mxu0 %v222_v30  ;;  %570 = vmatprep.subr.mxu1 %v815_v0 }
  0x72   : > { %274 = vmatprep.subr.mxu0 %v221_v31  ;;  %571 = vmatpush3.msra.mxu1 %v329_v45 }
  0x73   : > { %275 = vmatpush1.msra.mxu0 %v220_v32  ;;  %572 = vmatprep.subr.mxu1 %v815_v0 }
  0x74   : > { %276 = vmatprep.subr.mxu0 %v219_v33  ;;  %573 = vmatpush3.msra.mxu1 %v328_v46 }
  0x75   : > { %277 = vmatpush1.msra.mxu0 %v218_v34  ;;  %574 = vmatprep.subr.mxu1 %v815_v0 }
  0x76   : > { %278 = vmatprep.subr.mxu0 %v217_v35  ;;  %575 = vmatpush3.msra.mxu1 %v327_v47 }
  0x77   : > { %279 = vmatpush1.msra.mxu0 %v216_v36  ;;  %576 = vmatprep.subr.mxu1 %v815_v0 }
  0x78   : > { %313 = vmatmul.mubr.f32.vlgmr.msra.gmra.mxu0 %v215_v37  ;;  %577 = vmatpush3.msra.mxu1 %v326_v48 }
  0x79   : > { %578 = vmatprep.subr.mxu1 %v815_v0 }
  0x7a   : > { %579 = vmatpush3.msra.mxu1 %v325_v49 }
 0x138   : > { %v314_v50 = vpop.f32.mrf.mxu0 }
 0x139   : > { %v320_v51 = vmul.f32 0.70710677, %v314_v50  ;;  %v319_v53 = vmul.f32 0.5, %v314_v50 }
 0x13a   : > { %v316_v56 = vpop.f32.mrf.mxu0 }
 0x13b   : > { %656 = verf.f32 %v320_v51 }
 0x148   : > { %v657_v52 = vpop.eup %656 }
 0x149   : > { %v322_v54 = vadd.f32 1.0, %v657_v52 }
 0x14b   : > { %v323_v55 = vmul.f32 %v322_v54, %v319_v53 }
 0x14d   : > { %v324_v57 = vmul.f32 %v323_v55, %v316_v56 }
 0x14f   : > { %581 = vmatmul.mubr.f32.vlgmr.msra.gmra.mxu1 %v324_v57 }
 0x20f   : > { %v407_v58 = vpop.f32.mrf.mxu1 }
 0x210   : > { %411 = vst [vmem:[%s214_s18] sm:$0xff] %v407_v58 }
 0x211   : > { %v582_v59 = vpop.f32.mrf.mxu1 }
 0x212   : > { %751 = shalt.err (!%p748_p9)
}
 0x213   : > { %s752_s23 = scalar_lea.hbm %s999_s4, 128  ;;  %s756_s25 = scalar_lea.hbm %s1043_s3, 256 }
 0x214   : > { %p753_p13 = scmp.ne.s32.totalorder %s999_s4, %s752_s23  ;;  %p757_p4 = scmp.lt.s32.totalorder %s999_s4, %s1043_s3 }
 0x215   : > { %p758_p8 = scmp.lt.s32.totalorder %s756_s25, %s752_s23 }
 0x216   : > { %p754_p5 = pnand %p753_p13, %p1059_p0 }
 0x217   : > { %p759_p7 = por %p758_p8, %p757_p4 }
 0x218   : > { %p755_p10 = pneg %p754_p5 }
 0x21a   : > { %p760_p11 = pnand %p759_p7, %p755_p10 }
 0x21c   : > { %763 = shalt.err (!%p760_p11)
}
 0x21d   : > { %593 = dma.vmem_to_hbm [thread:$0]  (%p1059_p0), %s994_s20, 128, %s999_s4, %s413_s7  }
 0x21e PF: > { %s438_s5 = sand.u32 1, %s794_s12   ;;  %p1060_p1 = scmp.ne.s32.totalorder %s1049_s19, 0 }
 0x21f   : > { %p1061_p2 = scmp.ge.s32.totalorder %s806_s15, 2  ;;  %s439_s6 = scalar_lea.sflag [#allocation4], %s438_s5 }
 0x221   : > { %p607_p6 = pnand %p1061_p2, %p1060_p1 }
 0x223   : > { %p608_p12 = pneg %p607_p6 }
 0x225   : > { %789 = dma.done.wait (%p608_p12), %s439_s6, 128  }
 0x226   : > { %791 = vsyncadd (%p608_p12), %s439_s6, 4294967168  ;;  %p17_p3 = scmp.ge.s32.totalorder %s910_s9, 4   ;;  %s1062_s12 = smov %s798_s13 }
 0x227   : > { %s1063_s13 = smov %s802_s14  ;;  %s1064_s14 = smov %s919_s17 }
 0x228   : > { %s1065_s15 = smov %s910_s9  ;;  %19 = sbr.rel (!%p17_p3) target bundleno = 6 (0x6), region = 85 }
 0x22d   :  { %444 = vsyncpa [#allocation3], 1 }
 0x22e   :  { %446 = vsyncpa [#allocation3 + $0x1], 1 }
 0x22f   :  { %447 = vsyncpa [#allocation6], 1 }
 0x230   :  { %448 = vsyncpa [#allocation4], 1 }
 0x231   :  { %450 = vsyncpa [#allocation4 + $0x1], 1 }

</bundles_post_ra>
